<compile_context>
chip_gen: v7x
topology: tpu7x:2x2x1
jax: 0.10.0
libtpu: 0.0.40
codegen_flags: <defaults>
</compile_context>

<pallas_src>
import math
import functools

import jax
import jax.numpy as jnp
from jax.experimental import pallas as pl
from jax.experimental.pallas import tpu as pltpu


def _make_mha_kernel(batch: int, seq: int, embed: int, num_heads: int):
    B, S, E, H = batch, seq, embed, num_heads
    Dh = E // H

    def kernel(x_ref, wqkv_ref, bqkv_ref, wo_ref, bo_ref, o_ref):
        # --- fused QKV projection: one (B*S,E)@(E,3E) MXU push, f32 acc ---
        x = x_ref[...].astype(jnp.bfloat16)                        # (B*S, E)
        qkv = jnp.dot(x, wqkv_ref[...],
                      preferred_element_type=jnp.float32)          # (B*S, 3E)
        qkv = (qkv + bqkv_ref[...]).astype(jnp.bfloat16)           # bias + one cast

        q = qkv[:, 0 * E:1 * E]     # (B*S, E); 1/sqrt(Dh) already folded in
        k = qkv[:, 1 * E:2 * E]
        v = qkv[:, 2 * E:3 * E]

        # --- per-(batch, head) scaled dot-product attention, f32 softmax ---
        ctx_rows = []
        for b in range(B):
            r = b * S
            heads = []
            for h in range(H):
                c = h * Dh
                q_bh = q[r:r + S, c:c + Dh]                        # (S, Dh) bf16
                k_bh = k[r:r + S, c:c + Dh]
                v_bh = v[r:r + S, c:c + Dh]
                # q @ k.T via dot_general (no explicit transpose), f32 acc.
                s_bh = jax.lax.dot_general(
                    q_bh, k_bh, (((1,), (1,)), ((), ())),
                    preferred_element_type=jnp.float32)            # (S, S) f32
                s_bh = s_bh - jnp.max(s_bh, axis=-1, keepdims=True)
                p_bh = jnp.exp(s_bh)                               # EUP
                p_bh = p_bh * pl.reciprocal(
                    jnp.sum(p_bh, axis=-1, keepdims=True), approx=True)
                heads.append(jnp.dot(p_bh.astype(jnp.bfloat16), v_bh,
                                     preferred_element_type=jnp.float32))
            ctx_rows.append(jnp.concatenate(heads, axis=-1))       # (S, E) f32
        ctx = jnp.concatenate(ctx_rows, axis=0).astype(jnp.bfloat16)  # (B*S, E)

        # --- output projection: one (B*S,E)@(E,E) MXU push + f32 bias ---
        out = jnp.dot(ctx, wo_ref[...],
                      preferred_element_type=jnp.float32) + bo_ref[...]
        o_ref[...] = out.astype(o_ref.dtype)

    return kernel


def self_attention_pallas(x, in_proj_weight, in_proj_bias,
                          out_proj_weight, out_proj_bias, *, num_heads: int):
    """Forward of torch.nn.MultiheadAttention(batch_first=True), q=k=v=x.

    x:               (B, S, E) float32
    in_proj_weight:  (3E, E)  torch layout (y = x @ W.T)
    in_proj_bias:    (3E,)
    out_proj_weight: (E, E)   torch layout
    out_proj_bias:   (E,)
    """
    B, S, E = x.shape
    assert E % num_heads == 0
    H = num_heads
    Dh = E // H
    scale = 1.0 / math.sqrt(Dh)

    # --- wrapper-side parameter plumbing (XLA, done once, outside kernel) ---
    wq = in_proj_weight[0 * E:1 * E]
    wk = in_proj_weight[1 * E:2 * E]
    wv = in_proj_weight[2 * E:3 * E]
    bq = in_proj_bias[0 * E:1 * E]
    bk = in_proj_bias[1 * E:2 * E]
    bv = in_proj_bias[2 * E:3 * E]

    # Fused (E, 3E) weight for y = x @ W; columns [all-q | all-k | all-v],
    # head-major inside each block (matches torch's (B,S,H,Dh) head split).
    # 1/sqrt(Dh) is folded into the q columns / q bias.
    w_qkv = jnp.concatenate([wq.T * scale, wk.T, wv.T],
                            axis=1).astype(jnp.bfloat16)            # (E, 3E)
    b_qkv = jnp.concatenate([bq * scale, bk, bv]
                            ).reshape(1, 3 * E).astype(jnp.float32)  # (1, 3E)
    w_o = out_proj_weight.T.astype(jnp.bfloat16)                     # (E, E)
    b_o = out_proj_bias.reshape(1, E).astype(jnp.float32)            # (1, E)

    x2d = x.reshape(B * S, E)

    kernel = _make_mha_kernel(B, S, E, H)

    def full_spec(shape):
        return pl.BlockSpec(shape, lambda i: (0,) * len(shape))

    out2d = pl.pallas_call(
        kernel,
        out_shape=jax.ShapeDtypeStruct((B * S, E), jnp.float32),
        grid_spec=pltpu.PrefetchScalarGridSpec(
            num_scalar_prefetch=0,
            grid=(1,),                       # single step: whole batch folded
            in_specs=[
                full_spec((B * S, E)),       # x (rows = B*S)
                full_spec((E, 3 * E)),       # fused QKV weight
                full_spec((1, 3 * E)),       # fused QKV bias
                full_spec((E, E)),           # out-proj weight (already W.T)
                full_spec((1, E)),           # out-proj bias
            ],
            out_specs=full_spec((B * S, E)),
        ),
        compiler_params=pltpu.CompilerParams(
            dimension_semantics=("arbitrary",)),
    )(x2d, w_qkv, b_qkv, w_o, b_o)

    return out2d.reshape(B, S, E)


def self_attention_ref(x, in_proj_weight, in_proj_bias,
                       out_proj_weight, out_proj_bias, *, num_heads: int):
    """Pure-JAX (f32) reference of torch.nn.MultiheadAttention forward."""
    B, S, E = x.shape
    H = num_heads
    Dh = E // H
    wq, wk, wv = (in_proj_weight[:E], in_proj_weight[E:2 * E],
                  in_proj_weight[2 * E:])
    bq, bk, bv = (in_proj_bias[:E], in_proj_bias[E:2 * E], in_proj_bias[2 * E:])
    q = x @ wq.T + bq
    k = x @ wk.T + bk
    v = x @ wv.T + bv

    def split(t):  # (B, S, E) -> (B, H, S, Dh)
        return t.reshape(B, S, H, Dh).transpose(0, 2, 1, 3)

    qh, kh, vh = split(q), split(k), split(v)
    s = jnp.einsum("bhqd,bhkd->bhqk", qh, kh) / math.sqrt(Dh)
    p = jax.nn.softmax(s, axis=-1)
    o = jnp.einsum("bhqk,bhkd->bhqd", p, vh)
    o = o.transpose(0, 2, 1, 3).reshape(B, S, E)
    return o @ out_proj_weight.T + out_proj_bias


if __name__ == "__main__":
    # Small shapes consistent with the module: embed_dim=32, num_heads=4.
    B, S, E, H = 2, 8, 32, 4

    key = jax.random.PRNGKey(0)
    kx, kw_in, kb_in, kw_out, kb_out = jax.random.split(key, 5)

    x = jax.random.normal(kx, (B, S, E), dtype=jnp.float32)

    # Synthetic parameters with torch.nn.MultiheadAttention shapes.
    bound_in = math.sqrt(6.0 / (E + 3 * E))           # xavier_uniform on (3E, E)
    in_proj_weight = jax.random.uniform(
        kw_in, (3 * E, E), minval=-bound_in, maxval=bound_in, dtype=jnp.float32)
    in_proj_bias = 0.1 * jax.random.normal(kb_in, (3 * E,), dtype=jnp.float32)
    bound_out = 1.0 / math.sqrt(E)
    out_proj_weight = jax.random.uniform(
        kw_out, (E, E), minval=-bound_out, maxval=bound_out, dtype=jnp.float32)
    out_proj_bias = 0.1 * jax.random.normal(kb_out, (E,), dtype=jnp.float32)

    run = jax.jit(functools.partial(self_attention_pallas, num_heads=H))
    out = run(x, in_proj_weight, in_proj_bias, out_proj_weight, out_proj_bias)
    jax.block_until_ready(out)

    ref = self_attention_ref(x, in_proj_weight, in_proj_bias,
                             out_proj_weight, out_proj_bias, num_heads=H)
    assert out.shape == (B, S, E)
    max_err = float(jnp.max(jnp.abs(out - ref)))
    # bf16 MXU operands with f32 accumulation + approx reciprocal
    # -> ~1e-2-level agreement expected (intentional precision contract).
    assert jnp.allclose(out, ref, atol=3e-2, rtol=3e-2), \
        f"mismatch vs JAX reference (max abs err {max_err})"

    print("KERNEL_OK")
</pallas_src>

<mosaic_0001>
module attributes {stable_mosaic.version = 11 : i64} {
  func.func @kernel(%arg0: i32, %arg1: memref<16x32xf32, #tpu.memory_space<vmem>>, %arg2: memref<32x96xbf16, #tpu.memory_space<vmem>>, %arg3: memref<1x96xf32, #tpu.memory_space<vmem>>, %arg4: memref<32x32xbf16, #tpu.memory_space<vmem>>, %arg5: memref<1x32xf32, #tpu.memory_space<vmem>>, %arg6: memref<16x32xf32, #tpu.memory_space<vmem>>) attributes {dimension_semantics = [#tpu.dimension_semantics<arbitrary>], iteration_bounds = array<i64: 1>, scalar_prefetch = 0 : i64, scratch_operands = 0 : i64, tpu.core_type = #tpu.core_type<tc>, window_params = [{pipeline_mode = #tpu.pipeline_mode<synchronous>, transform_indices = @transform_0, window_bounds = array<i64: 16, 32>}, {pipeline_mode = #tpu.pipeline_mode<synchronous>, transform_indices = @transform_1, window_bounds = array<i64: 32, 96>}, {pipeline_mode = #tpu.pipeline_mode<synchronous>, transform_indices = @transform_2, window_bounds = array<i64: 1, 96>}, {pipeline_mode = #tpu.pipeline_mode<synchronous>, transform_indices = @transform_3, window_bounds = array<i64: 32, 32>}, {pipeline_mode = #tpu.pipeline_mode<synchronous>, transform_indices = @transform_4, window_bounds = array<i64: 1, 32>}, {pipeline_mode = #tpu.pipeline_mode<synchronous>, transform_indices = @transform_5, window_bounds = array<i64: 16, 32>}]} {
    %c0 = arith.constant 0 : index
    %c0_0 = arith.constant 0 : index
    %0 = vector.load %arg1[%c0, %c0_0] : memref<16x32xf32, #tpu.memory_space<vmem>>, vector<16x32xf32>
    %1 = arith.truncf %0 : vector<16x32xf32> to vector<16x32xbf16>
    %c0_1 = arith.constant 0 : index
    %c0_2 = arith.constant 0 : index
    %2 = vector.load %arg2[%c0_1, %c0_2] : memref<32x96xbf16, #tpu.memory_space<vmem>>, vector<32x96xbf16>
    %cst = arith.constant dense<0.000000e+00> : vector<16x96xf32>
    %3 = tpu.matmul %1, %2, %cst {dimension_numbers = #tpu.dot_dimension_numbers<[1], [0], [0], [1], [0, 0, 1, 1], [], []>} : vector<16x32xbf16>, vector<32x96xbf16>, vector<16x96xf32> -> vector<16x96xf32>
    %c0_3 = arith.constant 0 : index
    %c0_4 = arith.constant 0 : index
    %4 = vector.load %arg3[%c0_3, %c0_4] : memref<1x96xf32, #tpu.memory_space<vmem>>, vector<1x96xf32>
    %5 = vector.broadcast %4 : vector<1x96xf32> to vector<16x96xf32>
    %6 = arith.addf %3, %5 : vector<16x96xf32>
    %7 = arith.truncf %6 : vector<16x96xf32> to vector<16x96xbf16>
    %8 = vector.extract_strided_slice %7 {offsets = [0, 0], sizes = [16, 32], strides = [1, 1]} : vector<16x96xbf16> to vector<16x32xbf16>
    %9 = vector.extract_strided_slice %7 {offsets = [0, 32], sizes = [16, 32], strides = [1, 1]} : vector<16x96xbf16> to vector<16x32xbf16>
    %10 = vector.extract_strided_slice %7 {offsets = [0, 64], sizes = [16, 32], strides = [1, 1]} : vector<16x96xbf16> to vector<16x32xbf16>
    %11 = vector.extract_strided_slice %8 {offsets = [0, 0], sizes = [8, 8], strides = [1, 1]} : vector<16x32xbf16> to vector<8x8xbf16>
    %12 = vector.extract_strided_slice %9 {offsets = [0, 0], sizes = [8, 8], strides = [1, 1]} : vector<16x32xbf16> to vector<8x8xbf16>
    %13 = vector.extract_strided_slice %10 {offsets = [0, 0], sizes = [8, 8], strides = [1, 1]} : vector<16x32xbf16> to vector<8x8xbf16>
    %cst_5 = arith.constant dense<0.000000e+00> : vector<8x8xf32>
    %14 = tpu.matmul %11, %12, %cst_5 {dimension_numbers = #tpu.dot_dimension_numbers<[1], [1], [0], [0], [0, 0, 1, 0], [], []>} : vector<8x8xbf16>, vector<8x8xbf16>, vector<8x8xf32> -> vector<8x8xf32>
    %cst_6 = arith.constant dense<0xFF800000> : vector<8xf32>
    %15 = vector.multi_reduction <maximumf>, %14, %cst_6 [1] : vector<8x8xf32> to vector<8xf32>
    %16 = vector.shape_cast %15 : vector<8xf32> to vector<8x1xf32>
    %17 = vector.broadcast %16 : vector<8x1xf32> to vector<8x8xf32>
    %18 = arith.subf %14, %17 : vector<8x8xf32>
    %19 = math.exp %18 : vector<8x8xf32>
    %cst_7 = arith.constant dense<0.000000e+00> : vector<8xf32>
    %20 = vector.multi_reduction <add>, %19, %cst_7 [1] : vector<8x8xf32> to vector<8xf32>
    %21 = vector.shape_cast %20 : vector<8xf32> to vector<8x1xf32>
    %22 = tpu.reciprocal %21 {approx = true} : vector<8x1xf32> -> vector<8x1xf32>
    %23 = vector.broadcast %22 : vector<8x1xf32> to vector<8x8xf32>
    %24 = arith.mulf %19, %23 : vector<8x8xf32>
    %25 = arith.truncf %24 : vector<8x8xf32> to vector<8x8xbf16>
    %cst_8 = arith.constant dense<0.000000e+00> : vector<8x8xf32>
    %26 = tpu.matmul %25, %13, %cst_8 {dimension_numbers = #tpu.dot_dimension_numbers<[1], [0], [0], [1], [0, 0, 1, 1], [], []>} : vector<8x8xbf16>, vector<8x8xbf16>, vector<8x8xf32> -> vector<8x8xf32>
    %27 = vector.extract_strided_slice %8 {offsets = [0, 8], sizes = [8, 8], strides = [1, 1]} : vector<16x32xbf16> to vector<8x8xbf16>
    %28 = vector.extract_strided_slice %9 {offsets = [0, 8], sizes = [8, 8], strides = [1, 1]} : vector<16x32xbf16> to vector<8x8xbf16>
    %29 = vector.extract_strided_slice %10 {offsets = [0, 8], sizes = [8, 8], strides = [1, 1]} : vector<16x32xbf16> to vector<8x8xbf16>
    %cst_9 = arith.constant dense<0.000000e+00> : vector<8x8xf32>
    %30 = tpu.matmul %27, %28, %cst_9 {dimension_numbers = #tpu.dot_dimension_numbers<[1], [1], [0], [0], [0, 0, 1, 0], [], []>} : vector<8x8xbf16>, vector<8x8xbf16>, vector<8x8xf32> -> vector<8x8xf32>
    %cst_10 = arith.constant dense<0xFF800000> : vector<8xf32>
    %31 = vector.multi_reduction <maximumf>, %30, %cst_10 [1] : vector<8x8xf32> to vector<8xf32>
    %32 = vector.shape_cast %31 : vector<8xf32> to vector<8x1xf32>
    %33 = vector.broadcast %32 : vector<8x1xf32> to vector<8x8xf32>
    %34 = arith.subf %30, %33 : vector<8x8xf32>
    %35 = math.exp %34 : vector<8x8xf32>
    %cst_11 = arith.constant dense<0.000000e+00> : vector<8xf32>
    %36 = vector.multi_reduction <add>, %35, %cst_11 [1] : vector<8x8xf32> to vector<8xf32>
    %37 = vector.shape_cast %36 : vector<8xf32> to vector<8x1xf32>
    %38 = tpu.reciprocal %37 {approx = true} : vector<8x1xf32> -> vector<8x1xf32>
    %39 = vector.broadcast %38 : vector<8x1xf32> to vector<8x8xf32>
    %40 = arith.mulf %35, %39 : vector<8x8xf32>
    %41 = arith.truncf %40 : vector<8x8xf32> to vector<8x8xbf16>
    %cst_12 = arith.constant dense<0.000000e+00> : vector<8x8xf32>
    %42 = tpu.matmul %41, %29, %cst_12 {dimension_numbers = #tpu.dot_dimension_numbers<[1], [0], [0], [1], [0, 0, 1, 1], [], []>} : vector<8x8xbf16>, vector<8x8xbf16>, vector<8x8xf32> -> vector<8x8xf32>
    %43 = vector.extract_strided_slice %8 {offsets = [0, 16], sizes = [8, 8], strides = [1, 1]} : vector<16x32xbf16> to vector<8x8xbf16>
    %44 = vector.extract_strided_slice %9 {offsets = [0, 16], sizes = [8, 8], strides = [1, 1]} : vector<16x32xbf16> to vector<8x8xbf16>
    %45 = vector.extract_strided_slice %10 {offsets = [0, 16], sizes = [8, 8], strides = [1, 1]} : vector<16x32xbf16> to vector<8x8xbf16>
    %cst_13 = arith.constant dense<0.000000e+00> : vector<8x8xf32>
    %46 = tpu.matmul %43, %44, %cst_13 {dimension_numbers = #tpu.dot_dimension_numbers<[1], [1], [0], [0], [0, 0, 1, 0], [], []>} : vector<8x8xbf16>, vector<8x8xbf16>, vector<8x8xf32> -> vector<8x8xf32>
    %cst_14 = arith.constant dense<0xFF800000> : vector<8xf32>
    %47 = vector.multi_reduction <maximumf>, %46, %cst_14 [1] : vector<8x8xf32> to vector<8xf32>
    %48 = vector.shape_cast %47 : vector<8xf32> to vector<8x1xf32>
    %49 = vector.broadcast %48 : vector<8x1xf32> to vector<8x8xf32>
    %50 = arith.subf %46, %49 : vector<8x8xf32>
    %51 = math.exp %50 : vector<8x8xf32>
    %cst_15 = arith.constant dense<0.000000e+00> : vector<8xf32>
    %52 = vector.multi_reduction <add>, %51, %cst_15 [1] : vector<8x8xf32> to vector<8xf32>
    %53 = vector.shape_cast %52 : vector<8xf32> to vector<8x1xf32>
    %54 = tpu.reciprocal %53 {approx = true} : vector<8x1xf32> -> vector<8x1xf32>
    %55 = vector.broadcast %54 : vector<8x1xf32> to vector<8x8xf32>
    %56 = arith.mulf %51, %55 : vector<8x8xf32>
    %57 = arith.truncf %56 : vector<8x8xf32> to vector<8x8xbf16>
    %cst_16 = arith.constant dense<0.000000e+00> : vector<8x8xf32>
    %58 = tpu.matmul %57, %45, %cst_16 {dimension_numbers = #tpu.dot_dimension_numbers<[1], [0], [0], [1], [0, 0, 1, 1], [], []>} : vector<8x8xbf16>, vector<8x8xbf16>, vector<8x8xf32> -> vector<8x8xf32>
    %59 = vector.extract_strided_slice %8 {offsets = [0, 24], sizes = [8, 8], strides = [1, 1]} : vector<16x32xbf16> to vector<8x8xbf16>
    %60 = vector.extract_strided_slice %9 {offsets = [0, 24], sizes = [8, 8], strides = [1, 1]} : vector<16x32xbf16> to vector<8x8xbf16>
    %61 = vector.extract_strided_slice %10 {offsets = [0, 24], sizes = [8, 8], strides = [1, 1]} : vector<16x32xbf16> to vector<8x8xbf16>
    %cst_17 = arith.constant dense<0.000000e+00> : vector<8x8xf32>
    %62 = tpu.matmul %59, %60, %cst_17 {dimension_numbers = #tpu.dot_dimension_numbers<[1], [1], [0], [0], [0, 0, 1, 0], [], []>} : vector<8x8xbf16>, vector<8x8xbf16>, vector<8x8xf32> -> vector<8x8xf32>
    %cst_18 = arith.constant dense<0xFF800000> : vector<8xf32>
    %63 = vector.multi_reduction <maximumf>, %62, %cst_18 [1] : vector<8x8xf32> to vector<8xf32>
    %64 = vector.shape_cast %63 : vector<8xf32> to vector<8x1xf32>
    %65 = vector.broadcast %64 : vector<8x1xf32> to vector<8x8xf32>
    %66 = arith.subf %62, %65 : vector<8x8xf32>
    %67 = math.exp %66 : vector<8x8xf32>
    %cst_19 = arith.constant dense<0.000000e+00> : vector<8xf32>
    %68 = vector.multi_reduction <add>, %67, %cst_19 [1] : vector<8x8xf32> to vector<8xf32>
    %69 = vector.shape_cast %68 : vector<8xf32> to vector<8x1xf32>
    %70 = tpu.reciprocal %69 {approx = true} : vector<8x1xf32> -> vector<8x1xf32>
    %71 = vector.broadcast %70 : vector<8x1xf32> to vector<8x8xf32>
    %72 = arith.mulf %67, %71 : vector<8x8xf32>
    %73 = arith.truncf %72 : vector<8x8xf32> to vector<8x8xbf16>
    %cst_20 = arith.constant dense<0.000000e+00> : vector<8x8xf32>
    %74 = tpu.matmul %73, %61, %cst_20 {dimension_numbers = #tpu.dot_dimension_numbers<[1], [0], [0], [1], [0, 0, 1, 1], [], []>} : vector<8x8xbf16>, vector<8x8xbf16>, vector<8x8xf32> -> vector<8x8xf32>
    %75 = tpu.concatenate %26, %42, %58, %74 in 1 : vector<8x8xf32>, vector<8x8xf32>, vector<8x8xf32>, vector<8x8xf32> -> vector<8x32xf32>
    %76 = vector.extract_strided_slice %8 {offsets = [8, 0], sizes = [8, 8], strides = [1, 1]} : vector<16x32xbf16> to vector<8x8xbf16>
    %77 = vector.extract_strided_slice %9 {offsets = [8, 0], sizes = [8, 8], strides = [1, 1]} : vector<16x32xbf16> to vector<8x8xbf16>
    %78 = vector.extract_strided_slice %10 {offsets = [8, 0], sizes = [8, 8], strides = [1, 1]} : vector<16x32xbf16> to vector<8x8xbf16>
    %cst_21 = arith.constant dense<0.000000e+00> : vector<8x8xf32>
    %79 = tpu.matmul %76, %77, %cst_21 {dimension_numbers = #tpu.dot_dimension_numbers<[1], [1], [0], [0], [0, 0, 1, 0], [], []>} : vector<8x8xbf16>, vector<8x8xbf16>, vector<8x8xf32> -> vector<8x8xf32>
    %cst_22 = arith.constant dense<0xFF800000> : vector<8xf32>
    %80 = vector.multi_reduction <maximumf>, %79, %cst_22 [1] : vector<8x8xf32> to vector<8xf32>
    %81 = vector.shape_cast %80 : vector<8xf32> to vector<8x1xf32>
    %82 = vector.broadcast %81 : vector<8x1xf32> to vector<8x8xf32>
    %83 = arith.subf %79, %82 : vector<8x8xf32>
    %84 = math.exp %83 : vector<8x8xf32>
    %cst_23 = arith.constant dense<0.000000e+00> : vector<8xf32>
    %85 = vector.multi_reduction <add>, %84, %cst_23 [1] : vector<8x8xf32> to vector<8xf32>
    %86 = vector.shape_cast %85 : vector<8xf32> to vector<8x1xf32>
    %87 = tpu.reciprocal %86 {approx = true} : vector<8x1xf32> -> vector<8x1xf32>
    %88 = vector.broadcast %87 : vector<8x1xf32> to vector<8x8xf32>
    %89 = arith.mulf %84, %88 : vector<8x8xf32>
    %90 = arith.truncf %89 : vector<8x8xf32> to vector<8x8xbf16>
    %cst_24 = arith.constant dense<0.000000e+00> : vector<8x8xf32>
    %91 = tpu.matmul %90, %78, %cst_24 {dimension_numbers = #tpu.dot_dimension_numbers<[1], [0], [0], [1], [0, 0, 1, 1], [], []>} : vector<8x8xbf16>, vector<8x8xbf16>, vector<8x8xf32> -> vector<8x8xf32>
    %92 = vector.extract_strided_slice %8 {offsets = [8, 8], sizes = [8, 8], strides = [1, 1]} : vector<16x32xbf16> to vector<8x8xbf16>
    %93 = vector.extract_strided_slice %9 {offsets = [8, 8], sizes = [8, 8], strides = [1, 1]} : vector<16x32xbf16> to vector<8x8xbf16>
    %94 = vector.extract_strided_slice %10 {offsets = [8, 8], sizes = [8, 8], strides = [1, 1]} : vector<16x32xbf16> to vector<8x8xbf16>
    %cst_25 = arith.constant dense<0.000000e+00> : vector<8x8xf32>
    %95 = tpu.matmul %92, %93, %cst_25 {dimension_numbers = #tpu.dot_dimension_numbers<[1], [1], [0], [0], [0, 0, 1, 0], [], []>} : vector<8x8xbf16>, vector<8x8xbf16>, vector<8x8xf32> -> vector<8x8xf32>
    %cst_26 = arith.constant dense<0xFF800000> : vector<8xf32>
    %96 = vector.multi_reduction <maximumf>, %95, %cst_26 [1] : vector<8x8xf32> to vector<8xf32>
    %97 = vector.shape_cast %96 : vector<8xf32> to vector<8x1xf32>
    %98 = vector.broadcast %97 : vector<8x1xf32> to vector<8x8xf32>
    %99 = arith.subf %95, %98 : vector<8x8xf32>
    %100 = math.exp %99 : vector<8x8xf32>
    %cst_27 = arith.constant dense<0.000000e+00> : vector<8xf32>
    %101 = vector.multi_reduction <add>, %100, %cst_27 [1] : vector<8x8xf32> to vector<8xf32>
    %102 = vector.shape_cast %101 : vector<8xf32> to vector<8x1xf32>
    %103 = tpu.reciprocal %102 {approx = true} : vector<8x1xf32> -> vector<8x1xf32>
    %104 = vector.broadcast %103 : vector<8x1xf32> to vector<8x8xf32>
    %105 = arith.mulf %100, %104 : vector<8x8xf32>
    %106 = arith.truncf %105 : vector<8x8xf32> to vector<8x8xbf16>
    %cst_28 = arith.constant dense<0.000000e+00> : vector<8x8xf32>
    %107 = tpu.matmul %106, %94, %cst_28 {dimension_numbers = #tpu.dot_dimension_numbers<[1], [0], [0], [1], [0, 0, 1, 1], [], []>} : vector<8x8xbf16>, vector<8x8xbf16>, vector<8x8xf32> -> vector<8x8xf32>
    %108 = vector.extract_strided_slice %8 {offsets = [8, 16], sizes = [8, 8], strides = [1, 1]} : vector<16x32xbf16> to vector<8x8xbf16>
    %109 = vector.extract_strided_slice %9 {offsets = [8, 16], sizes = [8, 8], strides = [1, 1]} : vector<16x32xbf16> to vector<8x8xbf16>
    %110 = vector.extract_strided_slice %10 {offsets = [8, 16], sizes = [8, 8], strides = [1, 1]} : vector<16x32xbf16> to vector<8x8xbf16>
    %cst_29 = arith.constant dense<0.000000e+00> : vector<8x8xf32>
    %111 = tpu.matmul %108, %109, %cst_29 {dimension_numbers = #tpu.dot_dimension_numbers<[1], [1], [0], [0], [0, 0, 1, 0], [], []>} : vector<8x8xbf16>, vector<8x8xbf16>, vector<8x8xf32> -> vector<8x8xf32>
    %cst_30 = arith.constant dense<0xFF800000> : vector<8xf32>
    %112 = vector.multi_reduction <maximumf>, %111, %cst_30 [1] : vector<8x8xf32> to vector<8xf32>
    %113 = vector.shape_cast %112 : vector<8xf32> to vector<8x1xf32>
    %114 = vector.broadcast %113 : vector<8x1xf32> to vector<8x8xf32>
    %115 = arith.subf %111, %114 : vector<8x8xf32>
    %116 = math.exp %115 : vector<8x8xf32>
    %cst_31 = arith.constant dense<0.000000e+00> : vector<8xf32>
    %117 = vector.multi_reduction <add>, %116, %cst_31 [1] : vector<8x8xf32> to vector<8xf32>
    %118 = vector.shape_cast %117 : vector<8xf32> to vector<8x1xf32>
    %119 = tpu.reciprocal %118 {approx = true} : vector<8x1xf32> -> vector<8x1xf32>
    %120 = vector.broadcast %119 : vector<8x1xf32> to vector<8x8xf32>
    %121 = arith.mulf %116, %120 : vector<8x8xf32>
    %122 = arith.truncf %121 : vector<8x8xf32> to vector<8x8xbf16>
    %cst_32 = arith.constant dense<0.000000e+00> : vector<8x8xf32>
    %123 = tpu.matmul %122, %110, %cst_32 {dimension_numbers = #tpu.dot_dimension_numbers<[1], [0], [0], [1], [0, 0, 1, 1], [], []>} : vector<8x8xbf16>, vector<8x8xbf16>, vector<8x8xf32> -> vector<8x8xf32>
    %124 = vector.extract_strided_slice %8 {offsets = [8, 24], sizes = [8, 8], strides = [1, 1]} : vector<16x32xbf16> to vector<8x8xbf16>
    %125 = vector.extract_strided_slice %9 {offsets = [8, 24], sizes = [8, 8], strides = [1, 1]} : vector<16x32xbf16> to vector<8x8xbf16>
    %126 = vector.extract_strided_slice %10 {offsets = [8, 24], sizes = [8, 8], strides = [1, 1]} : vector<16x32xbf16> to vector<8x8xbf16>
    %cst_33 = arith.constant dense<0.000000e+00> : vector<8x8xf32>
    %127 = tpu.matmul %124, %125, %cst_33 {dimension_numbers = #tpu.dot_dimension_numbers<[1], [1], [0], [0], [0, 0, 1, 0], [], []>} : vector<8x8xbf16>, vector<8x8xbf16>, vector<8x8xf32> -> vector<8x8xf32>
    %cst_34 = arith.constant dense<0xFF800000> : vector<8xf32>
    %128 = vector.multi_reduction <maximumf>, %127, %cst_34 [1] : vector<8x8xf32> to vector<8xf32>
    %129 = vector.shape_cast %128 : vector<8xf32> to vector<8x1xf32>
    %130 = vector.broadcast %129 : vector<8x1xf32> to vector<8x8xf32>
    %131 = arith.subf %127, %130 : vector<8x8xf32>
    %132 = math.exp %131 : vector<8x8xf32>
    %cst_35 = arith.constant dense<0.000000e+00> : vector<8xf32>
    %133 = vector.multi_reduction <add>, %132, %cst_35 [1] : vector<8x8xf32> to vector<8xf32>
    %134 = vector.shape_cast %133 : vector<8xf32> to vector<8x1xf32>
    %135 = tpu.reciprocal %134 {approx = true} : vector<8x1xf32> -> vector<8x1xf32>
    %136 = vector.broadcast %135 : vector<8x1xf32> to vector<8x8xf32>
    %137 = arith.mulf %132, %136 : vector<8x8xf32>
    %138 = arith.truncf %137 : vector<8x8xf32> to vector<8x8xbf16>
    %cst_36 = arith.constant dense<0.000000e+00> : vector<8x8xf32>
    %139 = tpu.matmul %138, %126, %cst_36 {dimension_numbers = #tpu.dot_dimension_numbers<[1], [0], [0], [1], [0, 0, 1, 1], [], []>} : vector<8x8xbf16>, vector<8x8xbf16>, vector<8x8xf32> -> vector<8x8xf32>
    %140 = tpu.concatenate %91, %107, %123, %139 in 1 : vector<8x8xf32>, vector<8x8xf32>, vector<8x8xf32>, vector<8x8xf32> -> vector<8x32xf32>
    %141 = tpu.concatenate %75, %140 in 0 : vector<8x32xf32>, vector<8x32xf32> -> vector<16x32xf32>
    %142 = arith.truncf %141 : vector<16x32xf32> to vector<16x32xbf16>
    %c0_37 = arith.constant 0 : index
    %c0_38 = arith.constant 0 : index
    %143 = vector.load %arg4[%c0_37, %c0_38] : memref<32x32xbf16, #tpu.memory_space<vmem>>, vector<32x32xbf16>
    %cst_39 = arith.constant dense<0.000000e+00> : vector<16x32xf32>
    %144 = tpu.matmul %142, %143, %cst_39 {dimension_numbers = #tpu.dot_dimension_numbers<[1], [0], [0], [1], [0, 0, 1, 1], [], []>} : vector<16x32xbf16>, vector<32x32xbf16>, vector<16x32xf32> -> vector<16x32xf32>
    %c0_40 = arith.constant 0 : index
    %c0_41 = arith.constant 0 : index
    %145 = vector.load %arg5[%c0_40, %c0_41] : memref<1x32xf32, #tpu.memory_space<vmem>>, vector<1x32xf32>
    %146 = vector.broadcast %145 : vector<1x32xf32> to vector<16x32xf32>
    %147 = arith.addf %144, %146 : vector<16x32xf32>
    %c0_42 = arith.constant 0 : index
    %c0_43 = arith.constant 0 : index
    %148 = vector.load %arg6[%c0_42, %c0_43] : memref<16x32xf32, #tpu.memory_space<vmem>>, vector<16x32xf32>
    tpu.vector_store %arg6[%c0_42, %c0_43], %147 {strides = array<i32>} : memref<16x32xf32, #tpu.memory_space<vmem>>, vector<16x32xf32>,
    return
  }
  func.func @transform_0(%arg0: i32) -> (i32, i32) {
    %c0_i32 = arith.constant 0 : i32
    %c0_i32_0 = arith.constant 0 : i32
    %c0_i32_1 = arith.constant 0 : i32
    return %c0_i32, %c0_i32_0 : i32, i32
  }
  func.func @transform_1(%arg0: i32) -> (i32, i32) {
    %c0_i32 = arith.constant 0 : i32
    %c0_i32_0 = arith.constant 0 : i32
    %c0_i32_1 = arith.constant 0 : i32
    return %c0_i32, %c0_i32_0 : i32, i32
  }
  func.func @transform_2(%arg0: i32) -> (i32, i32) {
    %c0_i32 = arith.constant 0 : i32
    %c0_i32_0 = arith.constant 0 : i32
    %c0_i32_1 = arith.constant 0 : i32
    return %c0_i32, %c0_i32_0 : i32, i32
  }
  func.func @transform_3(%arg0: i32) -> (i32, i32) {
    %c0_i32 = arith.constant 0 : i32
    %c0_i32_0 = arith.constant 0 : i32
    %c0_i32_1 = arith.constant 0 : i32
    return %c0_i32, %c0_i32_0 : i32, i32
  }
  func.func @transform_4(%arg0: i32) -> (i32, i32) {
    %c0_i32 = arith.constant 0 : i32
    %c0_i32_0 = arith.constant 0 : i32
    %c0_i32_1 = arith.constant 0 : i32
    return %c0_i32, %c0_i32_0 : i32, i32
  }
  func.func @transform_5(%arg0: i32) -> (i32, i32) {
    %c0_i32 = arith.constant 0 : i32
    %c0_i32_0 = arith.constant 0 : i32
    %c0_i32_1 = arith.constant 0 : i32
    return %c0_i32, %c0_i32_0 : i32, i32
  }
}

</mosaic_0001>

<bundles_post_ra>
// kernel: self_attention_pallas.1
= control target key start
LH: loop header
LB: loop body
LE: loop exit
PB: predicated region body
PF: predicated region fallthrough
CT: control target
= control target key end

     0   :  { %v1359_v1 = vmov 0.0   ;;  %vm1360_vm0 = vmmov 0   ;;  %s1636_s0 = inlined_call_operand.vmem [shape: f32[16,32], index: 0, kind: input, shape index: {}]   ;;  %s1637_s1 = inlined_call_operand.vmem [shape: bf16[32,96], index: 1, kind: input, shape index: {}]   ;;  %s1638_s2 = inlined_call_operand.vmem [shape: f32[1,96], index: 2, kind: input, shape index: {}]   ;;  %s1639_s3 = inlined_call_operand.vmem [shape: bf16[32,32], index: 3, kind: input, shape index: {}]   ;;  %s1640_s4 = inlined_call_operand.vmem [shape: f32[1,32], index: 4, kind: input, shape index: {}]   ;;  %s1641_s5 = inlined_call_operand.hbm [shape: f32[16,32], index: 5, kind: output, shape index: {}]  }
   0x1   :  { %v1299_v0 = vld [vmem:[%s1637_s1] sm:$0xff]   ;;  %1154 = vmatprep.subr.bf16.mxu0 %v1359_v1  ;;  %1162 = vmatprep.subr.bf16.mxu1 %v1359_v1  ;;  %v1300_v2 = vld [vmem:[%s1637_s1 + $0x8] sm:$0xff]  }
   0x2   :  { %1155 = vmatpush3.bf16.msra.mxu0 %v1299_v0  ;;  %1158 = vmatprep.mubr.msk.bf16.mxu0 %vm1360_vm0, %v1359_v1  ;;  %v22_v3 = vld [vmem:[%s1636_s0] sm:$0xff]  ;;  %v23_v4 = vld [vmem:[%s1636_s0 + $0x8] sm:$0xff] }
   0x3   :  { %1156 = vmatprep.subr.bf16.mxu0 %v1359_v1  ;;  %1164 = vmatprep.mubr.msk.bf16.mxu1 %vm1360_vm0, %v1359_v1 }
   0x4   :  { %10 = vsyncpa [#allocation3], 0  ;;  %v24_v5 = vpack.c.bf16 %v23_v4, %v22_v3  ;;  %vm48_vm1 = vcmask 261120   ;;  %v1092_v6 = vld [vmem:[%s1638_s2] ss:$0 sm:$0xff]  ;;  %s1361_s0 = smov 120  }
   0x5   :  { %s1362_s27 = smov 96   ;;  %s1363_s28 = smov 80   ;;  %vm97_vm2 = vcmask 64512   ;;  %vm161_vm3 = vcmask 1043456   ;;  %vm548_vm4 = vcmask 130048   ;;  %vm550_vm5 = vcmask 195584  }
   0x6   :  { %1157 = vmatpush3.bf16.msra.mxu0 %v1300_v2  ;;  %s1364_s29 = smov 88   ;;  %s1365_s2 = smov 72  }
   0x7   :  { %1168 = vmatprep.subr.bf16.mxu0 %v1359_v1  ;;  %s1366_s30 = smov 112   ;;  %s1367_s6 = smov 104  }
   0x8   :  { %s1368_s7 = smov 56   ;;  %s1369_s8 = smov 64  }
   0x9   :  { %1159 = vmatmul.mubr.msk.bf16.vlgmr.msra.gmra.mrb[0].mxu0 %vm48_vm1, %v24_v5  ;;  %s1370_s9 = smov 48   ;;  %s1371_s10 = smov 40  }
   0xa   :  { %1170 = vmatprep.mubr.msk.bf16.mxu0 %vm1360_vm0, %v1359_v1  ;;  %s1372_s13 = smov 8   ;;  %s1373_s16 = smov 16  }
   0xb   :  { %s1374_s17 = smov 24   ;;  %s1375_s19 = smov [#allocation2]  }
   0xc   :  { %s1081_s20 = sshll.u32 %s1375_s19, 4  ;;  %s1082_s20 = int_to_ptr.vmem [resolvable:$true] %s1081_s20 }
   0xd   :  { %s1335_s21 = scalar_lea.vmem %s1082_s20, 256  ;;  %p1340_p1 = scmp.lt.s32.totalorder %s1082_s20, %s1082_s20 }
   0xe   :  { %p1336_p0 = scmp.ne.s32.totalorder %s1082_s20, %s1335_s21  ;;  %p1341_p2 = scmp.lt.s32.totalorder %s1335_s21, %s1335_s21 }
  0x10   :  { %p1342_p3 = por %p1341_p2, %p1340_p1 }
  0x12   :  { %p1343_p4 = pnand %p1342_p3, %p1336_p0 }
  0xdc   :  { %v86_v7 = vpop.f32.mrb[0].mxu0 }
  0xdd   :  { %v1160_v8 = vpop.f32.mrb[1].mxu0  ;;  %v87_v10 = vadd.f32 %v1092_v6, %v86_v7 }
  0xde   :  { %v89_v9 = vpop.f32.mrb[2].mxu0 }
  0xdf   :  { %v90_v11 = vadd.f32 %v1092_v6, %v89_v9  ;;  %v1161_v12 = vpop.f32.mrb[3].mxu0 }
  0xe1   :  { %v1433_v13 = vpack.c.bf16 %v90_v11, %v87_v10 }
  0xe3   :  { %205 = vrot.lane.b32.xlu1 %v1433_v13, %s1361_s0  ;;  %95 = vrot.lane.b32.xlu0 %v1433_v13, %s1362_s27  ;;  %v1442_v14 = vrot.slane %v1433_v13, 4 }
  0xe7   :  { %317 = vrot.lane.b32.xlu1 %v1433_v13, %s1363_s28  ;;  %207 = vrot.lane.b32.xlu0 %v1433_v13, %s1364_s29 }
  0xeb   :  { %427 = vrot.lane.b32.xlu1 %v1433_v13, %s1365_s2  ;;  %315 = vrot.lane.b32.xlu0 %v1433_v13, %s1366_s30 }
  0xef   :  { %425 = vrot.lane.b32.xlu0 %v1433_v13, %s1367_s6  ;;  %553 = vrot.lane.b32.xlu1 %v1442_v14, %s1362_s27 }
  0xf3   :  { %663 = vrot.lane.b32.xlu0 %v1442_v14, %s1364_s29  ;;  %661 = vrot.lane.b32.xlu1 %v1442_v14, %s1361_s0 }
  0xf7   :  { %773 = vrot.lane.b32.xlu0 %v1442_v14, %s1363_s28  ;;  %771 = vrot.lane.b32.xlu1 %v1442_v14, %s1366_s30 }
  0xfb   :  { %883 = vrot.lane.b32.xlu0 %v1442_v14, %s1365_s2  ;;  %881 = vrot.lane.b32.xlu1 %v1442_v14, %s1367_s6 }
 0x155   :  { %v96_v15 = vpop.permute.xlu0 %95  ;;  %v206_v18 = vpop.permute.xlu1 %205 }
 0x156   :  { %v102_v16 = vsel %vm97_vm2, %v96_v15, 0 }
 0x157   :  { %1163 = vmatpush3.bf16.xpose.msra.mxu1 %v102_v16 }
 0x158   :  { %1174 = vmatprep.subr.bf16.mxu1 %v1359_v1 }
 0x159   :  { %v208_v17 = vpop.permute.xlu0 %207  ;;  %v318_v20 = vpop.permute.xlu1 %317 }
 0x15a   :  { %v213_v19 = vsel %vm97_vm2, %v208_v17, 0  ;;  %v323_v21 = vsel %vm97_vm2, %v318_v20, 0 }
 0x15d   :  { %v428_v22 = vpop.permute.xlu1 %427  ;;  %v316_v23 = vpop.permute.xlu0 %315 }
 0x15e   :  { %1165 = vmatmul.mubr.msk.bf16.vlgmr.msra.gmra.mrb[0].mxu1 %vm97_vm2, %v1433_v13  ;;  %v433_v24 = vsel %vm97_vm2, %v428_v22, 0 }
 0x15f   :  { %1175 = vmatpush3.bf16.xpose.msra.mxu1 %v213_v19  ;;  %1176 = vmatprep.mubr.msk.bf16.mxu1 %vm1360_vm0, %v1359_v1 }
 0x160   :  { %1186 = vmatprep.subr.bf16.mxu1 %v1359_v1 }
 0x161   :  { %v554_v25 = vpop.permute.xlu1 %553  ;;  %v426_v26 = vpop.permute.xlu0 %425 }
 0x162   :  { %v559_v27 = vsel %vm97_vm2, %v554_v25, 0 }
 0x165   :  { %v664_v28 = vpop.permute.xlu0 %663  ;;  %v662_v31 = vpop.permute.xlu1 %661 }
 0x166   :  { %1177 = vmatmul.mubr.msk.bf16.vlgmr.msra.gmra.mrb[4].mxu1 %vm97_vm2, %v206_v18  ;;  %v669_v29 = vsel %vm97_vm2, %v664_v28, 0 }
 0x167   :  { %1187 = vmatpush3.bf16.xpose.msra.mxu1 %v323_v21  ;;  %1188 = vmatprep.mubr.msk.bf16.mxu1 %vm1360_vm0, %v1359_v1 }
 0x168   :  { %1198 = vmatprep.subr.bf16.mxu1 %v1359_v1 }
 0x169   :  { %v774_v30 = vpop.permute.xlu0 %773  ;;  %v772_v34 = vpop.permute.xlu1 %771 }
 0x16a   :  { %v779_v32 = vsel %vm97_vm2, %v774_v30, 0 }
 0x16d   :  { %v884_v33 = vpop.permute.xlu0 %883  ;;  %v882_v36 = vpop.permute.xlu1 %881 }
 0x16e   :  { %1189 = vmatmul.mubr.msk.bf16.vlgmr.msra.gmra.mrb[8].mxu1 %vm97_vm2, %v316_v23  ;;  %v889_v35 = vsel %vm97_vm2, %v884_v33, 0 }
 0x16f   :  { %1199 = vmatpush3.bf16.xpose.msra.mxu1 %v433_v24  ;;  %1200 = vmatprep.mubr.msk.bf16.mxu1 %vm1360_vm0, %v1359_v1 }
 0x170   :  { %1210 = vmatprep.subr.bf16.mxu1 %v1359_v1 }
 0x176   :  { %1201 = vmatmul.mubr.msk.bf16.vlgmr.msra.gmra.mrb[12].mxu1 %vm97_vm2, %v426_v26 }
 0x177   :  { %1211 = vmatpush3.bf16.xpose.msra.mxu1 %v559_v27  ;;  %1212 = vmatprep.mubr.msk.bf16.mxu1 %vm1360_vm0, %v1359_v1 }
 0x178   :  { %1222 = vmatprep.subr.bf16.mxu1 %v1359_v1 }
 0x17e   :  { %1213 = vmatmul.mubr.msk.bf16.vlgmr.msra.gmra.mrb[16].mxu1 %vm97_vm2, %v1442_v14 }
 0x17f   :  { %1223 = vmatpush3.bf16.xpose.msra.mxu1 %v669_v29  ;;  %1224 = vmatprep.mubr.msk.bf16.mxu1 %vm1360_vm0, %v1359_v1 }
 0x180   :  { %1234 = vmatprep.subr.bf16.mxu1 %v1359_v1 }
 0x186   :  { %1225 = vmatmul.mubr.msk.bf16.vlgmr.msra.gmra.mrb[20].mxu1 %vm97_vm2, %v662_v31 }
 0x187   :  { %1235 = vmatpush3.bf16.xpose.msra.mxu1 %v779_v32  ;;  %1236 = vmatprep.mubr.msk.bf16.mxu1 %vm1360_vm0, %v1359_v1 }
 0x188   :  { %1246 = vmatprep.subr.bf16.mxu1 %v1359_v1 }
 0x18e   :  { %1237 = vmatmul.mubr.msk.bf16.vlgmr.msra.gmra.mrb[24].mxu1 %vm97_vm2, %v772_v34 }
 0x18f   :  { %1247 = vmatpush3.bf16.xpose.msra.mxu1 %v889_v35  ;;  %1248 = vmatprep.mubr.msk.bf16.mxu1 %vm1360_vm0, %v1359_v1 }
 0x190   :  { %1258 = vmatprep.subr.bf16.mxu1 %v1359_v1 }
 0x196   :  { %1249 = vmatmul.mubr.msk.bf16.vlgmr.msra.gmra.mrb[28].mxu1 %vm97_vm2, %v882_v36 }
 0x197   :  { %1262 = vmatprep.mubr.msk.bf16.mxu1 %vm1360_vm0, %v1359_v1 }
 0x231   :  { %v138_v37 = vpop.f32.mrb[0].mxu1 }
 0x232   :  { %v1166_v38 = vpop.f32.mrb[1].mxu1  ;;  %v144_v39 = vsel %vm97_vm2, %v138_v37, -inf }
 0x233   :  { %v141_v40 = vpop.f32.mrb[2].mxu1  ;;  %145 = vmax.xlane.f32.xlu0 %v144_v39 }
 0x234   :  { %v1167_v41 = vpop.f32.mrb[3].mxu1 }
 0x239   :  { %v249_v42 = vpop.f32.mrb[4].mxu1 }
 0x23a   :  { %v1178_v43 = vpop.f32.mrb[5].mxu1  ;;  %v255_v44 = vsel %vm97_vm2, %v249_v42, -inf }
 0x23b   :  { %v252_v45 = vpop.f32.mrb[6].mxu1  ;;  %256 = vmax.xlane.f32.xlu1 %v255_v44 }
 0x23c   :  { %v1179_v46 = vpop.f32.mrb[7].mxu1 }
 0x241   :  { %v359_v47 = vpop.f32.mrb[8].mxu1 }
 0x242   :  { %v1190_v48 = vpop.f32.mrb[9].mxu1  ;;  %v365_v49 = vsel %vm97_vm2, %v359_v47, -inf }
 0x243   :  { %v362_v50 = vpop.f32.mrb[10].mxu1  ;;  %366 = vmax.xlane.f32.xlu0 %v365_v49 }
 0x244   :  { %v1191_v51 = vpop.f32.mrb[11].mxu1 }
 0x249   :  { %v1497_v52 = vpop.f32.mrb[12].mxu1 }
 0x24a   :  { %v1202_v53 = vpop.f32.mrb[13].mxu1  ;;  %v475_v54 = vsel %vm97_vm2, %v1497_v52, -inf }
 0x24b   :  { %v472_v55 = vpop.f32.mrb[14].mxu1  ;;  %476 = vmax.xlane.f32.xlu0 %v475_v54 }
 0x24c   :  { %v1203_v56 = vpop.f32.mrb[15].mxu1 }
 0x251   :  { %v1501_v57 = vpop.f32.mrb[16].mxu1 }
 0x252   :  { %v1214_v58 = vpop.f32.mrb[17].mxu1  ;;  %v601_v59 = vsel %vm97_vm2, %v1501_v57, -inf }
 0x253   :  { %602 = vmax.xlane.f32.xlu1 %v601_v59  ;;  %v598_v60 = vpop.f32.mrb[18].mxu1 }
 0x254   :  { %v1215_v61 = vpop.f32.mrb[19].mxu1 }
 0x259   :  { %v1505_v62 = vpop.f32.mrb[20].mxu1 }
 0x25a   :  { %v1226_v63 = vpop.f32.mrb[21].mxu1  ;;  %v711_v0 = vsel %vm97_vm2, %v1505_v62, -inf }
 0x25b   :  { %712 = vmax.xlane.f32.xlu0 %v711_v0  ;;  %v708_v2 = vpop.f32.mrb[22].mxu1 }
 0x25c   :  { %v1227_v3 = vpop.f32.mrb[23].mxu1 }
 0x261   :  { %v815_v4 = vpop.f32.mrb[24].mxu1 }
 0x262   :  { %v1238_v5 = vpop.f32.mrb[25].mxu1  ;;  %v821_v6 = vsel %vm97_vm2, %v815_v4, -inf }
 0x263   :  { %822 = vmax.xlane.f32.xlu1 %v821_v6  ;;  %v818_v7 = vpop.f32.mrb[26].mxu1 }
 0x264   :  { %v1239_v8 = vpop.f32.mrb[27].mxu1 }
 0x269   :  { %v1510_v9 = vpop.f32.mrb[28].mxu1 }
 0x26a   :  { %v1250_v10 = vpop.f32.mrb[29].mxu1  ;;  %v931_v15 = vsel %vm97_vm2, %v1510_v9, -inf }
 0x26b   :  { %v928_v11 = vpop.f32.mrb[30].mxu1 }
 0x26c   :  { %v1251_v12 = vpop.f32.mrb[31].mxu1 }
 0x271   :  { %267 = vrot.lane.b32.xlu0 %v1433_v13, %s1368_s7 }
 0x274   :  { %156 = vrot.lane.b32.xlu1 %v1433_v13, %s1369_s8 }
 0x290   :  { %932 = vmax.xlane.f32.xlu0 %v931_v15 }
 0x2c0   :  { %v146_v16 = vpop.xlane.xlu0 %145 }
 0x2c1   :  { %v147_v17 = vsub.f32 %v138_v37, %v146_v16 }
 0x2c3   :  { %v148_v18 = vmul.f32 1.442695, %v147_v17 }
 0x2c5   :  { %1303 = vpow2.f32 %v148_v18 }
 0x2c8   :  { %v257_v19 = vpop.xlane.xlu1 %256 }
 0x2c9   :  { %v258_v20 = vsub.f32 %v249_v42, %v257_v19 }
 0x2cb   :  { %v259_v21 = vmul.f32 1.442695, %v258_v20 }
 0x2cd   :  { %1305 = vpow2.f32 %v259_v21 }
 0x2cf   :  { %v1518_v22 = vpop.eup %1303 }
 0x2d0   :  { %v367_v23 = vpop.xlane.xlu0 %366  ;;  %v150_v24 = vsel %vm97_vm2, %v1518_v22, 0.0 }
 0x2d1   :  { %v368_v25 = vsub.f32 %v359_v47, %v367_v23  ;;  %151 = vadd.xlane.f32.xlu1 %v150_v24 }
 0x2d3   :  { %v369_v26 = vmul.f32 1.442695, %v368_v25 }
 0x2d5   :  { %1307 = vpow2.f32 %v369_v26 }
 0x2d7   :  { %v1522_v27 = vpop.eup %1305 }
 0x2d8   :  { %v261_v28 = vsel %vm97_vm2, %v1522_v27, 0.0  ;;  %v477_v34 = vpop.xlane.xlu0 %476 }
 0x2d9   :  { %262 = vadd.xlane.f32.xlu0 %v261_v28  ;;  %v478_v36 = vsub.f32 %v1497_v52, %v477_v34 }
 0x2db   :  { %v479_v37 = vmul.f32 1.442695, %v478_v36 }
 0x2dd   :  { %1309 = vpow2.f32 %v479_v37 }
 0x2df   :  { %v1526_v29 = vpop.eup %1307 }
 0x2e0   :  { %v371_v30 = vsel %vm97_vm2, %v1526_v29, 0.0  ;;  %v603_v31 = vpop.xlane.xlu1 %602 }
 0x2e1   :  { %372 = vadd.xlane.f32.xlu1 %v371_v30  ;;  %v604_v38 = vsub.f32 %v1501_v57, %v603_v31 }
 0x2e3   :  { %v605_v41 = vmul.f32 1.442695, %v604_v38 }
 0x2e5   :  { %1311 = vpow2.f32 %v605_v41 }
 0x2e7   :  { %v1310_v44 = vpop.eup %1309 }
 0x2e8   :  { %v713_v39 = vpop.xlane.xlu0 %712  ;;  %v481_v45 = vsel %vm97_vm2, %v1310_v44, 0.0 }
 0x2e9   :  { %v714_v40 = vsub.f32 %v1505_v62, %v713_v39 }
 0x2ec   :  { %v268_v52 = vpop.permute.xlu0 %267 }
 0x2ed   :  { %v273_v63 = vsel %vm161_vm3, %v268_v52, 0 }
 0x2ef   :  { %377 = vrot.lane.b32.xlu0 %v1433_v13, %s1370_s9  ;;  %v1540_v46 = vpop.eup %1311 }
 0x2f0   :  { %v823_v32 = vpop.xlane.xlu1 %822  ;;  %v607_v48 = vsel %vm97_vm2, %v1540_v46, 0.0 }
 0x2f1   :  { %v824_v42 = vsub.f32 %v815_v4, %v823_v32 }
 0x2f2   :  { %487 = vrot.lane.b32.xlu1 %v1433_v13, %s1371_s10  ;;  %v715_v13 = vmul.f32 1.442695, %v714_v40 }
 0x2f3   :  { %v825_v43 = vmul.f32 1.442695, %v824_v42 }
 0x2f4   :  { %v157_v33 = vpop.permute.xlu1 %156  ;;  %1313 = vpow2.f32 %v715_v13 }
 0x2f5   :  { %v163_v35 = vsel %vm161_vm3, %v157_v33, 0  ;;  %1315 = vpow2.f32 %v825_v43 }
 0x2f6   :  { %1169 = vmatpush3.bf16.msra.mxu0 %v163_v35 }
 0x2f7   :  { %1180 = vmatprep.subr.bf16.mxu0 %v1359_v1 }
 0x2fe   :  { %v1542_v47 = vpop.eup %1313 }
 0x2ff   :  { %v1546_v49 = vpop.eup %1315  ;;  %v717_v50 = vsel %vm97_vm2, %v1542_v47, 0.0 }
 0x300   :  { %v827_v51 = vsel %vm97_vm2, %v1546_v49, 0.0 }
 0x30e   :  { %482 = vadd.xlane.f32.xlu0 %v481_v45 }
 0x312   :  { %608 = vadd.xlane.f32.xlu0 %v607_v48 }
 0x316   :  { %718 = vadd.xlane.f32.xlu1 %v717_v50  ;;  %828 = vadd.xlane.f32.xlu0 %v827_v51 }
 0x31d   :  { %v933_v53 = vpop.xlane.xlu0 %932 }
 0x31e   :  { %v934_v54 = vsub.f32 %v1510_v9, %v933_v53 }
 0x320   :  { %v935_v55 = vmul.f32 1.442695, %v934_v54 }
 0x322   :  { %1317 = vpow2.f32 %v935_v55 }
 0x327   :  { %723 = vrot.lane.b32.xlu1 %v1442_v14, %s1368_s7 }
 0x32b   :  { %833 = vrot.lane.b32.xlu1 %v1442_v14, %s1370_s9 }
 0x32c   :  { %v1557_v56 = vpop.eup %1317 }
 0x32d   :  { %v937_v57 = vsel %vm97_vm2, %v1557_v56, 0.0 }
 0x32e   :  { %938 = vadd.xlane.f32.xlu0 %v937_v57 }
 0x32f   :  { %943 = vrot.lane.b32.xlu1 %v1442_v14, %s1371_s10 }
 0x344   :  { %613 = vrot.lane.b32.xlu0 %v1442_v14, %s1369_s8 }
 0x35e   :  { %v152_v58 = vpop.xlane.xlu1 %151 }
 0x35f   :  { %1319 = vrcp.f32 %v152_v58 }
 0x366   :  { %v263_v59 = vpop.xlane.xlu0 %262 }
 0x367   :  { %1321 = vrcp.f32 %v263_v59 }
 0x369   :  { %v1320_v60 = vpop.eup %1319 }
 0x36a   :  { %v154_v61 = vmul.f32 %v1320_v60, %v1518_v22  ;;  %v378_v3 = vpop.permute.xlu0 %377 }
 0x36b   :  { %v383_v5 = vsel %vm161_vm3, %v378_v3, 0 }
 0x36c   :  { %v155_v62 = vpack.c.bf16 %v154_v61, %v154_v61  ;;  %v1301_v61 = vld [vmem:[%s1639_s3] sm:$0xff]  }
 0x36d   :  { %1259 = vmatpush3.bf16.msra.mxu1 %v1301_v61 }
 0x36e   :  { %1171 = vmatmul.mubr.msk.bf16.vlgmr.msra.gmra.mrb[4].mxu0 %vm97_vm2, %v155_v62  ;;  %v373_v0 = vpop.xlane.xlu1 %372  ;;  %1260 = vmatprep.subr.bf16.mxu1 %v1359_v1 }
 0x36f   :  { %1181 = vmatpush3.bf16.msra.mxu0 %v273_v63  ;;  %1323 = vrcp.f32 %v373_v0  ;;  %1182 = vmatprep.mubr.msk.bf16.mxu0 %vm1360_vm0, %v1359_v1 }
 0x370   :  { %1192 = vmatprep.subr.bf16.mxu0 %v1359_v1 }
 0x371   :  { %v1322_v14 = vpop.eup %1321 }
 0x372   :  { %v265_v2 = vmul.f32 %v1322_v14, %v1522_v27  ;;  %v488_v8 = vpop.permute.xlu1 %487 }
 0x373   :  { %v493_v10 = vsel %vm161_vm3, %v488_v8, 0 }
 0x374   :  { %v266_v4 = vpack.c.bf16 %v265_v2, %v265_v2  ;;  %v1302_v2 = vld [vmem:[%s1639_s3 + $0x8] sm:$0xff]  }
 0x375   :  { %1261 = vmatpush3.bf16.msra.mxu1 %v1302_v2 }
 0x376   :  { %1183 = vmatmul.mubr.msk.bf16.vlgmr.msra.gmra.mrb[8].mxu0 %vm97_vm2, %v266_v4 }
 0x377   :  { %1193 = vmatpush3.bf16.msra.mxu0 %v383_v5  ;;  %1194 = vmatprep.mubr.msk.bf16.mxu0 %vm1360_vm0, %v1359_v1 }
 0x378   :  { %1204 = vmatprep.subr.bf16.mxu0 %v1359_v1 }
 0x379   :  { %v1324_v6 = vpop.eup %1323 }
 0x37a   :  { %v375_v7 = vmul.f32 %v1324_v6, %v1526_v29 }
 0x37c   :  { %v376_v9 = vpack.c.bf16 %v375_v7, %v375_v7 }
 0x37e   :  { %1195 = vmatmul.mubr.msk.bf16.vlgmr.msra.gmra.mrb[12].mxu0 %vm97_vm2, %v376_v9 }
 0x37f   :  { %1205 = vmatpush3.bf16.msra.mxu0 %v493_v10  ;;  %1206 = vmatprep.mubr.msk.bf16.mxu0 %vm1360_vm0, %v1359_v1 }
 0x380   :  { %1216 = vmatprep.subr.bf16.mxu0 %v1359_v1 }
 0x39b   :  { %v483_v11 = vpop.xlane.xlu0 %482 }
 0x39c   :  { %1325 = vrcp.f32 %v483_v11 }
 0x39f   :  { %v609_v17 = vpop.xlane.xlu0 %608 }
 0x3a0   :  { %1327 = vrcp.f32 %v609_v17 }
 0x3a3   :  { %v719_v18 = vpop.xlane.xlu1 %718  ;;  %v829_v19 = vpop.xlane.xlu0 %828 }
 0x3a4   :  { %1329 = vrcp.f32 %v719_v18 }
 0x3a5   :  { %1331 = vrcp.f32 %v829_v19 }
 0x3a6   :  { %v1326_v12 = vpop.eup %1325 }
 0x3a7   :  { %v485_v15 = vmul.f32 %v1326_v12, %v1310_v44  ;;  %v724_v25 = vpop.permute.xlu1 %723 }
 0x3a8   :  { %v729_v28 = vsel %vm161_vm3, %v724_v25, 0 }
 0x3a9   :  { %v486_v16 = vpack.c.bf16 %v485_v15, %v485_v15 }
 0x3aa   :  { %v1328_v20 = vpop.eup %1327 }
 0x3ab   :  { %1207 = vmatmul.mubr.msk.bf16.vlgmr.msra.gmra.mrb[16].mxu0 %vm97_vm2, %v486_v16  ;;  %v611_v22 = vmul.f32 %v1328_v20, %v1540_v46  ;;  %v834_v30 = vpop.permute.xlu1 %833 }
 0x3ac   :  { %1218 = vmatprep.mubr.msk.bf16.mxu0 %vm1360_vm0, %v1359_v1  ;;  %v839_v33 = vsel %vm161_vm3, %v834_v30, 0  ;;  %v1112_v30 = vld [vmem:[%s1640_s4] ss:$0 sm:$0xff] }
 0x3ad   :  { %v612_v26 = vpack.c.bf16 %v611_v22, %v611_v22 }
 0x3ae   :  { %v1330_v27 = vpop.eup %1329 }
 0x3af   :  { %v721_v29 = vmul.f32 %v1330_v27, %v1542_v47  ;;  %v1332_v32 = vpop.eup %1331  ;;  %v944_v35 = vpop.permute.xlu1 %943 }
 0x3b0   :  { %v831_v34 = vmul.f32 %v1332_v32, %v1546_v49  ;;  %v949_v38 = vsel %vm161_vm3, %v944_v35, 0 }
 0x3b1   :  { %v722_v31 = vpack.c.bf16 %v721_v29, %v721_v29 }
 0x3b2   :  { %v832_v36 = vpack.c.bf16 %v831_v34, %v831_v34 }
 0x3bb   :  { %v939_v21 = vpop.xlane.xlu0 %938 }
 0x3bc   :  { %1333 = vrcp.f32 %v939_v21 }
 0x3bf   :  { %v614_v23 = vpop.permute.xlu0 %613 }
 0x3c0   :  { %v619_v24 = vsel %vm161_vm3, %v614_v23, 0 }
 0x3c1   :  { %1217 = vmatpush3.bf16.msra.mxu0 %v619_v24 }
 0x3c2   :  { %1228 = vmatprep.subr.bf16.mxu0 %v1359_v1 }
 0x3c4   :  { %1219 = vmatmul.mubr.msk.bf16.vlgmr.msra.gmra.mrb[20].mxu0 %vm97_vm2, %v612_v26 }
 0x3c5   :  { %1229 = vmatpush3.bf16.msra.mxu0 %v729_v28  ;;  %1230 = vmatprep.mubr.msk.bf16.mxu0 %vm1360_vm0, %v1359_v1 }
 0x3c6   :  { %1240 = vmatprep.subr.bf16.mxu0 %v1359_v1  ;;  %v1334_v37 = vpop.eup %1333 }
 0x3c7   :  { %v941_v39 = vmul.f32 %v1334_v37, %v1557_v56 }
 0x3c9   :  { %v942_v40 = vpack.c.bf16 %v941_v39, %v941_v39 }
 0x3cc   :  { %1231 = vmatmul.mubr.msk.bf16.vlgmr.msra.gmra.mrb[24].mxu0 %vm97_vm2, %v722_v31 }
 0x3cd   :  { %1241 = vmatpush3.bf16.msra.mxu0 %v839_v33  ;;  %1242 = vmatprep.mubr.msk.bf16.mxu0 %vm1360_vm0, %v1359_v1 }
 0x3ce   :  { %1252 = vmatprep.subr.bf16.mxu0 %v1359_v1 }
 0x3d4   :  { %1243 = vmatmul.mubr.msk.bf16.vlgmr.msra.gmra.mrb[28].mxu0 %vm97_vm2, %v832_v36 }
 0x3d5   :  { %1253 = vmatpush3.bf16.msra.mxu0 %v949_v38  ;;  %1254 = vmatprep.mubr.msk.bf16.mxu0 %vm1360_vm0, %v1359_v1 }
 0x3dc   :  { %1255 = vmatmul.mubr.msk.bf16.vlgmr.msra.gmra.mrb[32].mxu0 %vm97_vm2, %v942_v40 }
 0x441   :  { %v199_v41 = vpop.f32.mrb[4].mxu0 }
 0x442   :  { %v1172_v42 = vpop.f32.mrb[5].mxu0 }
 0x443   :  { %v202_v13 = vpop.f32.mrb[6].mxu0 }
 0x444   :  { %v1173_v43 = vpop.f32.mrb[7].mxu0 }
 0x449   :  { %v309_v44 = vpop.f32.mrb[8].mxu0 }
 0x44a   :  { %v1184_v45 = vpop.f32.mrb[9].mxu0 }
 0x44b   :  { %v312_v46 = vpop.f32.mrb[10].mxu0 }
 0x44c   :  { %v1185_v47 = vpop.f32.mrb[11].mxu0 }
 0x451   :  { %v419_v48 = vpop.f32.mrb[12].mxu0 }
 0x452   :  { %v1196_v49 = vpop.f32.mrb[13].mxu0 }
 0x453   :  { %v422_v50 = vpop.f32.mrb[14].mxu0 }
 0x454   :  { %v1197_v51 = vpop.f32.mrb[15].mxu0 }
 0x47e   :  { %v529_v52 = vpop.f32.mrb[16].mxu0 }
 0x47f   :  { %v1208_v53 = vpop.f32.mrb[17].mxu0 }
 0x480   :  { %v532_v54 = vpop.f32.mrb[18].mxu0 }
 0x481   :  { %v1209_v55 = vpop.f32.mrb[19].mxu0 }
 0x497   :  { %v655_v56 = vpop.f32.mrb[20].mxu0 }
 0x498   :  { %v1220_v57 = vpop.f32.mrb[21].mxu0 }
 0x499   :  { %v658_v58 = vpop.f32.mrb[22].mxu0 }
 0x49a   :  { %v1221_v59 = vpop.f32.mrb[23].mxu0 }
 0x49f   :  { %v765_v60 = vpop.f32.mrb[24].mxu0 }
 0x4a0   :  { %v1284_v62 = vpack.i.bf16 %v765_v60, %v309_v44  ;;  %v1232_v63 = vpop.f32.mrb[25].mxu0 }
 0x4a1   :  { %v768_v0 = vpop.f32.mrb[26].mxu0 }
 0x4a2   :  { %1285 = vrot.lane.b32.xlu1 %v1284_v62, %s1372_s13  ;;  %v1233_v14 = vpop.f32.mrb[27].mxu0 }
 0x4a7   :  { %v875_v3 = vpop.f32.mrb[28].mxu0 }
 0x4a8   :  { %v1289_v4 = vpack.i.bf16 %v875_v3, %v419_v48  ;;  %v1244_v5 = vpop.f32.mrb[29].mxu0 }
 0x4a9   :  { %v878_v6 = vpop.f32.mrb[30].mxu0 }
 0x4aa   :  { %1290 = vrot.lane.b32.xlu1 %v1289_v4, %s1373_s16  ;;  %v1245_v7 = vpop.f32.mrb[31].mxu0 }
 0x4af   :  { %v985_v8 = vpop.f32.mrb[32].mxu0 }
 0x4b0   :  { %v1294_v9 = vpack.i.bf16 %v985_v8, %v529_v52  ;;  %v1256_v10 = vpop.f32.mrb[33].mxu0 }
 0x4b1   :  { %v988_v11 = vpop.f32.mrb[34].mxu0 }
 0x4b2   :  { %1295 = vrot.lane.b32.xlu0 %v1294_v9, %s1374_s17  ;;  %v1257_v12 = vpop.f32.mrb[35].mxu0 }
 0x514   :  { %v1286_v1 = vpop.permute.xlu1 %1285 }
 0x515   :  { %v1288_v16 = vunpack.i.h.bf16 %v1286_v1  ;;  %v1287_v17 = vunpack.i.l.bf16 %v1286_v1 }
 0x517   :  { %v1003_v21 = vsel %vm97_vm2, %v655_v56, %v1288_v16  ;;  %v547_v22 = vsel %vm97_vm2, %v199_v41, %v1287_v17 }
 0x51c   :  { %v1291_v15 = vpop.permute.xlu1 %1290 }
 0x51d   :  { %v1293_v18 = vunpack.i.h.bf16 %v1291_v15  ;;  %v1292_v19 = vunpack.i.l.bf16 %v1291_v15 }
 0x51f   :  { %v1004_v25 = vsel %vm548_vm4, %v1003_v21, %v1293_v18  ;;  %v549_v26 = vsel %vm548_vm4, %v547_v22, %v1292_v19 }
 0x524   :  { %v1296_v20 = vpop.permute.xlu0 %1295 }
 0x525   :  { %v1298_v23 = vunpack.i.h.bf16 %v1296_v20  ;;  %v1297_v24 = vunpack.i.l.bf16 %v1296_v20 }
 0x527   :  { %v1005_v27 = vsel %vm550_vm5, %v1004_v25, %v1298_v23  ;;  %v551_v28 = vsel %vm550_vm5, %v549_v26, %v1297_v24 }
 0x528   :  { %v1006_v29 = vpack.c.bf16 %v1005_v27, %v551_v28 }
 0x52a   :  { %1263 = vmatmul.mubr.msk.bf16.vlgmr.msra.gmra.mrb[32].mxu1 %vm48_vm1, %v1006_v29 }
 0x5fd   :  { %v1067_v31 = vpop.f32.mrb[32].mxu1 }
 0x5fe   :  { %v1068_v32 = vadd.f32 %v1112_v30, %v1067_v31  ;;  %v1264_v33 = vpop.f32.mrb[33].mxu1 }
 0x5ff   :  { %v1070_v34 = vpop.f32.mrb[34].mxu1 }
 0x600   :  { %1074 = vst.msk [vmem:[#allocation2] sm:$0xff] %vm48_vm1, %v1068_v32  ;;  %v1071_v35 = vadd.f32 %v1112_v30, %v1070_v34  ;;  %v1265_v36 = vpop.f32.mrb[35].mxu1 }
 0x602   :  { %1075 = vst.msk [vmem:[#allocation2 + $0x8] sm:$0xff] %vm48_vm1, %v1071_v35 }
 0x603   :  { %1346 = shalt.err (!%p1343_p4)
}
 0x604   :  { %s1347_s23 = scalar_lea.hbm %s1641_s5, 256 }
 0x605   :  { %p1348_p5 = scmp.ne.s32.totalorder %s1641_s5, %s1347_s23  ;;  %p1351_p6 = scmp.lt.u32.totalorder %s1347_s23, %s1641_s5 }
 0x607   :  { %p1353_p7 = pnand %p1351_p6, %p1348_p5 }
 0x609   :  { %1356 = shalt.err (!%p1353_p7)
}
 0x60a   :  { %s1376_s0 = smov 128  }
 0x60b   :  { %1087 = dma.vmem_to_hbm [thread:$0]  %s1082_s20, 256, %s1641_s5, [#allocation3], %s1376_s0, %s1376_s0, %s1372_s13  }
 0x60c   :  { %1357 = dma.done.wait [#allocation3], 256  }
 0x60d   :  { %1358 = vsyncadd [#allocation3], 4294967040 }
 0x60e   :  { %1091 = vsyncpa [#allocation3], 1 }

</bundles_post_ra>
